<compile_context>
chip_gen: v6e
topology: v6e:2x2x1
jax: 0.10.0
libtpu: 0.0.40
codegen_flags: <defaults>
</compile_context>

<pallas_src>
import jax
import jax.numpy as jnp
from jax.experimental import pallas as pl
from jax.experimental.pallas import tpu as pltpu


def se_block_kernel(x_ref, wd_ref, bd_ref, wu_ref, bu_ref, o_ref):
    # x_ref block: (TB, C, HWp) native dtype.
    # wd: (C, N), bd: (1, N), wu: (N, C), bu: (1, C) all f32.
    x = x_ref[...].astype(jnp.float32)                       # (TB, C, HWp)

    # Gx = ||x||_2 over spatial dims, per (batch, channel) -> (TB, C).
    # Padded lanes are zero so they do not perturb the reduction.
    gx = jnp.sqrt(jnp.sum(x * x, axis=-1))                   # (TB, C)

    # Gx.mean over a size-1 axis == Gx (exact PyTorch semantics).
    s = gx / (gx + 1e-6)                                     # (TB, C)

    # down 1x1 conv == batched matmul (TB, C) @ (C, N) + bias, then relu.
    y = jnp.dot(s, wd_ref[...], preferred_element_type=jnp.float32) + bd_ref[...]
    y = jnp.maximum(y, 0.0)                                  # (TB, N)

    # up 1x1 conv == batched matmul (TB, N) @ (N, C) + bias, then sigmoid.
    z = jnp.dot(y, wu_ref[...], preferred_element_type=jnp.float32) + bu_ref[...]
    z = jax.nn.sigmoid(z)                                    # (TB, C)

    # inputs * per-channel scale (broadcast over spatial), back to native dtype.
    o_ref[...] = (x * z[:, :, None]).astype(o_ref.dtype)


def _pick_tb(B, C, HWp, itemsize, max_tb=8, slab_budget_bytes=6 << 20):
    """Largest divisor of B (capped at max_tb) whose per-step slab fits the
    VMEM budget (budget ~= scoped_limit / 4 for double-buffered in + out)."""
    for cand in range(min(B, max_tb), 0, -1):
        if B % cand == 0 and cand * C * HWp * itemsize <= slab_budget_bytes:
            return cand
    return 1


def se_block(x_nchw, w_down, b_down, w_up, b_up):
    """x_nchw: (B, C, H, W) any float dtype.  w_down: (N, C, 1, 1),
    b_down: (N,), w_up: (C, N, 1, 1), b_up: (C,).  Returns (B, C, H, W) in
    the input dtype."""
    B, C, H, W = x_nchw.shape
    N = w_down.shape[0]
    HW = H * W
    HWp = ((HW + 127) // 128) * 128                          # lane-dense last dim
    in_dtype = x_nchw.dtype

    x = x_nchw.reshape(B, C, HW)
    if HWp != HW:
        # zero pad -> safe for the sum(x*x) reduction inside the kernel.
        x = jnp.pad(x, ((0, 0), (0, 0), (0, HWp - HW)))

    # Pre-transpose the tiny 1x1-conv weights so the kernel does row-major
    # batched matmuls: down (C, N), up (N, C).
    wd = w_down.reshape(N, C).T.astype(jnp.float32)          # (C, N)
    bd = b_down.reshape(1, N).astype(jnp.float32)
    wu = w_up.reshape(C, N).T.astype(jnp.float32)            # (N, C)
    bu = b_up.reshape(1, C).astype(jnp.float32)

    tb = _pick_tb(B, C, HWp, jnp.dtype(in_dtype).itemsize)
    # TODO(synk): for v7x (2 TCs) when B // tb < 2, split the HW axis into a
    # parallel grid dim (two-pass reduce-then-apply) so both cores get work;
    # same two-pass structure is the fallback when one slab exceeds VMEM.

    out = pl.pallas_call(
        se_block_kernel,
        out_shape=jax.ShapeDtypeStruct((B, C, HWp), in_dtype),
        grid_spec=pltpu.PrefetchScalarGridSpec(
            num_scalar_prefetch=0,
            grid=(B // tb,),
            in_specs=[
                pl.BlockSpec((tb, C, HWp), lambda b: (b, 0, 0)),  # x slab
                pl.BlockSpec((C, N), lambda b: (0, 0)),           # down weight
                pl.BlockSpec((1, N), lambda b: (0, 0)),           # down bias
                pl.BlockSpec((N, C), lambda b: (0, 0)),           # up weight
                pl.BlockSpec((1, C), lambda b: (0, 0)),           # up bias
            ],
            out_specs=pl.BlockSpec((tb, C, HWp), lambda b: (b, 0, 0)),
        ),
        compiler_params=pltpu.CompilerParams(
            dimension_semantics=("parallel",),
            vmem_limit_bytes=48 * 1024 * 1024,
        ),
    )(x, wd, bd, wu, bu)

    if HWp != HW:
        out = out[:, :, :HW]
    return out.reshape(B, C, H, W)


def se_block_ref(x_nchw, w_down, b_down, w_up, b_up):
    """Plain-JAX reference mirroring the PyTorch forward."""
    B, C, H, W = x_nchw.shape
    N = w_down.shape[0]
    xf = x_nchw.astype(jnp.float32)
    gx = jnp.sqrt(jnp.sum(xf ** 2, axis=(2, 3), keepdims=True))   # (B, C, 1, 1)
    scale = gx / (jnp.mean(gx, axis=-1, keepdims=True) + 1e-6)
    v = scale.reshape(B, C)
    y = jnp.maximum(v @ w_down.reshape(N, C).T + b_down, 0.0)
    z = jax.nn.sigmoid(y @ w_up.reshape(C, N).T + b_up)
    return (xf * z.reshape(B, C, 1, 1)).astype(x_nchw.dtype)


if __name__ == "__main__":
    key = jax.random.PRNGKey(0)
    B, C, H, W = 2, 4, 16, 16
    N = 8  # internal_neurons

    k1, k2, k3, k4, k5 = jax.random.split(key, 5)
    x = jax.random.normal(k1, (B, C, H, W), dtype=jnp.float32)
    # Conv2d(in=C, out=N, k=1) -> weight (N, C, 1, 1), bias (N,)
    w_down = jax.random.normal(k2, (N, C, 1, 1), dtype=jnp.float32) * 0.2
    b_down = jax.random.normal(k3, (N,), dtype=jnp.float32) * 0.1
    # Conv2d(in=N, out=C, k=1) -> weight (C, N, 1, 1), bias (C,)
    w_up = jax.random.normal(k4, (C, N, 1, 1), dtype=jnp.float32) * 0.2
    b_up = jax.random.normal(k5, (C,), dtype=jnp.float32) * 0.1

    out = se_block(x, w_down, b_down, w_up, b_up)
    out = jax.block_until_ready(out)

    ref = se_block_ref(x, w_down, b_down, w_up, b_up)
    assert out.shape == (B, C, H, W)
    assert out.dtype == x.dtype
    assert jnp.allclose(out, ref, atol=1e-5, rtol=1e-5), "mismatch vs reference"

    print("KERNEL_OK")
</pallas_src>

<mosaic_0001>
module attributes {stable_mosaic.version = 11 : i64} {
  func.func @se_block_kernel(%arg0: i32, %arg1: memref<2x4x256xf32, #tpu.memory_space<vmem>>, %arg2: memref<4x8xf32, #tpu.memory_space<vmem>>, %arg3: memref<1x8xf32, #tpu.memory_space<vmem>>, %arg4: memref<8x4xf32, #tpu.memory_space<vmem>>, %arg5: memref<1x4xf32, #tpu.memory_space<vmem>>, %arg6: memref<2x4x256xf32, #tpu.memory_space<vmem>>) attributes {dimension_semantics = [#tpu.dimension_semantics<parallel>], iteration_bounds = array<i64: 1>, scalar_prefetch = 0 : i64, scratch_operands = 0 : i64, tpu.core_type = #tpu.core_type<tc>, window_params = [{transform_indices = @transform_0, window_bounds = array<i64: 2, 4, 256>}, {pipeline_mode = #tpu.pipeline_mode<synchronous>, transform_indices = @transform_1, window_bounds = array<i64: 4, 8>}, {pipeline_mode = #tpu.pipeline_mode<synchronous>, transform_indices = @transform_2, window_bounds = array<i64: 1, 8>}, {pipeline_mode = #tpu.pipeline_mode<synchronous>, transform_indices = @transform_3, window_bounds = array<i64: 8, 4>}, {pipeline_mode = #tpu.pipeline_mode<synchronous>, transform_indices = @transform_4, window_bounds = array<i64: 1, 4>}, {transform_indices = @transform_5, window_bounds = array<i64: 2, 4, 256>}]} {
    %c0 = arith.constant 0 : index
    %c0_0 = arith.constant 0 : index
    %c0_1 = arith.constant 0 : index
    %0 = vector.load %arg1[%c0, %c0_0, %c0_1] : memref<2x4x256xf32, #tpu.memory_space<vmem>>, vector<2x4x256xf32>
    %1 = arith.mulf %0, %0 : vector<2x4x256xf32>
    %cst = arith.constant dense<0.000000e+00> : vector<2x4xf32>
    %2 = vector.multi_reduction <add>, %1, %cst [2] : vector<2x4x256xf32> to vector<2x4xf32>
    %3 = math.sqrt %2 : vector<2x4xf32>
    %cst_2 = arith.constant 9.99999997E-7 : f32
    %4 = vector.broadcast %cst_2 : f32 to vector<2x4xf32>
    %5 = arith.addf %3, %4 : vector<2x4xf32>
    %6 = arith.divf %3, %5 : vector<2x4xf32>
    %c0_3 = arith.constant 0 : index
    %c0_4 = arith.constant 0 : index
    %7 = vector.load %arg2[%c0_3, %c0_4] : memref<4x8xf32, #tpu.memory_space<vmem>>, vector<4x8xf32>
    %cst_5 = arith.constant dense<0.000000e+00> : vector<2x8xf32>
    %8 = tpu.matmul %6, %7, %cst_5 {dimension_numbers = #tpu.dot_dimension_numbers<[1], [0], [0], [1], [0, 0, 1, 1], [], []>} : vector<2x4xf32>, vector<4x8xf32>, vector<2x8xf32> -> vector<2x8xf32>
    %c0_6 = arith.constant 0 : index
    %c0_7 = arith.constant 0 : index
    %9 = vector.load %arg3[%c0_6, %c0_7] : memref<1x8xf32, #tpu.memory_space<vmem>>, vector<1x8xf32>
    %10 = vector.broadcast %9 : vector<1x8xf32> to vector<2x8xf32>
    %11 = arith.addf %8, %10 : vector<2x8xf32>
    %cst_8 = arith.constant 0.000000e+00 : f32
    %12 = vector.broadcast %cst_8 : f32 to vector<2x8xf32>
    %13 = arith.maximumf %11, %12 : vector<2x8xf32>
    %c0_9 = arith.constant 0 : index
    %c0_10 = arith.constant 0 : index
    %14 = vector.load %arg4[%c0_9, %c0_10] : memref<8x4xf32, #tpu.memory_space<vmem>>, vector<8x4xf32>
    %cst_11 = arith.constant dense<0.000000e+00> : vector<2x4xf32>
    %15 = tpu.matmul %13, %14, %cst_11 {dimension_numbers = #tpu.dot_dimension_numbers<[1], [0], [0], [1], [0, 0, 1, 1], [], []>} : vector<2x8xf32>, vector<8x4xf32>, vector<2x4xf32> -> vector<2x4xf32>
    %c0_12 = arith.constant 0 : index
    %c0_13 = arith.constant 0 : index
    %16 = vector.load %arg5[%c0_12, %c0_13] : memref<1x4xf32, #tpu.memory_space<vmem>>, vector<1x4xf32>
    %17 = vector.broadcast %16 : vector<1x4xf32> to vector<2x4xf32>
    %18 = arith.addf %15, %17 : vector<2x4xf32>
    %19 = arith.negf %18 : vector<2x4xf32>
    %20 = math.exp %19 : vector<2x4xf32>
    %cst_14 = arith.constant 1.000000e+00 : f32
    %21 = vector.broadcast %cst_14 : f32 to vector<2x4xf32>
    %22 = arith.addf %21, %20 : vector<2x4xf32>
    %23 = arith.divf %21, %22 : vector<2x4xf32>
    %24 = vector.shape_cast %23 : vector<2x4xf32> to vector<2x4x1xf32>
    %25 = vector.broadcast %24 : vector<2x4x1xf32> to vector<2x4x256xf32>
    %26 = arith.mulf %0, %25 : vector<2x4x256xf32>
    %c0_15 = arith.constant 0 : index
    %c0_16 = arith.constant 0 : index
    %c0_17 = arith.constant 0 : index
    %27 = vector.load %arg6[%c0_15, %c0_16, %c0_17] : memref<2x4x256xf32, #tpu.memory_space<vmem>>, vector<2x4x256xf32>
    tpu.vector_store %arg6[%c0_15, %c0_16, %c0_17], %26 {strides = array<i32>} : memref<2x4x256xf32, #tpu.memory_space<vmem>>, vector<2x4x256xf32>,
    return
  }
  func.func @transform_0(%arg0: i32) -> (i32, i32, i32) {
    %c0_i32 = arith.constant 0 : i32
    %c0_i32_0 = arith.constant 0 : i32
    %c0_i32_1 = arith.constant 0 : i32
    return %arg0, %c0_i32, %c0_i32_0 : i32, i32, i32
  }
  func.func @transform_1(%arg0: i32) -> (i32, i32) {
    %c0_i32 = arith.constant 0 : i32
    %c0_i32_0 = arith.constant 0 : i32
    %c0_i32_1 = arith.constant 0 : i32
    return %c0_i32, %c0_i32_0 : i32, i32
  }
  func.func @transform_2(%arg0: i32) -> (i32, i32) {
    %c0_i32 = arith.constant 0 : i32
    %c0_i32_0 = arith.constant 0 : i32
    %c0_i32_1 = arith.constant 0 : i32
    return %c0_i32, %c0_i32_0 : i32, i32
  }
  func.func @transform_3(%arg0: i32) -> (i32, i32) {
    %c0_i32 = arith.constant 0 : i32
    %c0_i32_0 = arith.constant 0 : i32
    %c0_i32_1 = arith.constant 0 : i32
    return %c0_i32, %c0_i32_0 : i32, i32
  }
  func.func @transform_4(%arg0: i32) -> (i32, i32) {
    %c0_i32 = arith.constant 0 : i32
    %c0_i32_0 = arith.constant 0 : i32
    %c0_i32_1 = arith.constant 0 : i32
    return %c0_i32, %c0_i32_0 : i32, i32
  }
  func.func @transform_5(%arg0: i32) -> (i32, i32, i32) {
    %c0_i32 = arith.constant 0 : i32
    %c0_i32_0 = arith.constant 0 : i32
    %c0_i32_1 = arith.constant 0 : i32
    return %arg0, %c0_i32, %c0_i32_0 : i32, i32, i32
  }
}

</mosaic_0001>

<bundles_post_ra>
// kernel: tpu_custom_call.1
= control target key start
LH: loop header
LB: loop body
LE: loop exit
PB: predicated region body
PF: predicated region fallthrough
CT: control target
= control target key end

     0   :  { %10 = vsyncpa [#allocation3], 0  ;;  %s475_s0 = inlined_call_operand.hbm [shape: f32[2,4,256], index: 0, kind: input, shape index: {}]   ;;  %s476_s1 = inlined_call_operand.vmem [shape: f32[4,8], index: 1, kind: input, shape index: {}]   ;;  %s477_s2 = inlined_call_operand.vmem [shape: f32[1,8], index: 2, kind: input, shape index: {}]   ;;  %s478_s3 = inlined_call_operand.vmem [shape: f32[8,4], index: 3, kind: input, shape index: {}]   ;;  %s479_s4 = inlined_call_operand.vmem [shape: f32[1,4], index: 4, kind: input, shape index: {}]   ;;  %s480_s5 = inlined_call_operand.hbm [shape: f32[2,4,256], index: 5, kind: output, shape index: {}]  }
   0x1   :  { %11 = vsyncpa [#allocation4], 0  ;;  %s399_s18 = smov [#allocation2]  }
   0x2   :  { %s17_s19 = sshll.u32 %s399_s18, 4  ;;  %s18_s19 = int_to_ptr.vmem [resolvable:$true] %s17_s19 }
   0x3   :  { %s363_s20 = scalar_lea.vmem %s18_s19, 256  ;;  %p368_p1 = scmp.lt.s32.totalorder %s18_s19, %s18_s19 }
   0x4   :  { %p364_p0 = scmp.ne.s32.totalorder %s18_s19, %s363_s20  ;;  %p369_p2 = scmp.lt.s32.totalorder %s363_s20, %s363_s20 }
   0x6   :  { %p370_p3 = por %p369_p2, %p368_p1 }
   0x8   :  { %p371_p4 = pnand %p370_p3, %p364_p0 }
   0xa   :  { %374 = shalt.err (!%p371_p4)
}
   0xb   :  { %s400_s21 = smov 128   ;;  %s401_s22 = smov 8  }
   0xc   :  { %23 = dma.hbm_to_vmem [thread:$0]  %s475_s0, 256, %s18_s19, [#allocation3], %s400_s21, %s400_s21, %s401_s22  }
   0xd   :  { %395 = dma.done.wait [#allocation3], 256  }
   0xe   :  { %396 = vsyncadd [#allocation3], 4294967040  ;;  %v442_v0 = vld [vmem:[#allocation2] sm:$0xff]  ;;  %vm45_vm0 = vcmask 1043456   ;;  %v444_v1 = vld [vmem:[#allocation2 + $0x8] sm:$0xff]  ;;  %v402_v13 = vmov 0.0   ;;  %v86_v28 = vlaneseq }
   0xf   :  { %v37_v2 = vmul.f32 %v442_v0, %v442_v0  ;;  %v38_v3 = vmul.f32 %v444_v1, %v444_v1  ;;  %v76_v12 = vld [vmem:[%s476_s1] sm:$0xf]  ;;  %326 = vmatprep.subr.mxu0 %v402_v13  ;;  %vm403_vm1 = vmmov 0   ;;  %331 = vmatprep.subr.mxu1 %v402_v13  ;;  %vm96_vm6 = vcmask 1041409  }
  0x10   :  { %328 = vmatprep.mubr.msk.f32.mxu0 %vm403_vm1, %v402_v13  ;;  %327 = vmatpush3.msk.msra.mxu0 %vm45_vm0, %v76_v12  ;;  %v87_v29 = vand.u32 127, %v86_v28  ;;  %v89_v30 = vshrl.u32 %v86_v28, 7  ;;  %vm98_vm7 = vcmask 31744   ;;  %v175_v39 = vld [vmem:[%s478_s3] sm:$0xff]  ;;  %vm183_vm8 = vcmask 64512  }
  0x11   :  { %v41_v4 = vcombine.high %v37_v2, %v37_v2  ;;  %v46_v5 = vsel %vm45_vm0, %v37_v2, 0.0  ;;  %v42_v6 = vcombine.high %v38_v3, %v38_v3  ;;  %v51_v8 = vsel %vm45_vm0, %v38_v3, 0.0  ;;  %333 = vmatprep.mubr.msk.f32.mxu1 %vm403_vm1, %v402_v13  ;;  %332 = vmatpush3.msra.mxu1 %v175_v39  ;;  %v316_v40 = vld [vmem:[%s477_s2] ss:$0 sm:$0xff]  ;;  %s405_s2 = smov [#allocation5]  }
  0x12   :  { %v90_v33 = vsub.s32 %v87_v29, %v89_v30  ;;  %v319_v45 = vld [vmem:[%s479_s4] ss:$0 sm:$0xff]  ;;  %v265_v52 = vsub.s32 0, %v89_v30  ;;  %v272_v55 = vsub.s32 1, %v89_v30  ;;  %v404_v57 = vmov 839922192  }
  0x13   :  { %v47_v7 = vsel %vm45_vm0, %v41_v4, 0.0  ;;  %v52_v9 = vsel %vm45_vm0, %v42_v6, 0.0  ;;  %v280_v58 = vunpack.c.l.s4 %v404_v57  ;;  %s304_s3 = sshll.u32 %s405_s2, 4  ;;  %s305_s3 = int_to_ptr.vmem [resolvable:$true] %s304_s3 }
  0x14   :  { %v48_v10 = vadd.f32 %v47_v7, %v46_v5  ;;  %v53_v11 = vadd.f32 %v52_v9, %v51_v8  ;;  %s375_s4 = scalar_lea.vmem %s305_s3, 256  ;;  %p380_p6 = scmp.lt.s32.totalorder %s305_s3, %s305_s3 }
  0x15   :  { %v281_v59 = vunpack.c.0.s8 %v280_v58  ;;  %p376_p5 = scmp.ne.s32.totalorder %s305_s3, %s375_s4  ;;  %p381_p7 = scmp.lt.s32.totalorder %s375_s4, %s375_s4 }
  0x16   :  { %49 = vadd.xlane.f32.xlu0 %v48_v10 }
  0x17   :  { %v284_v60 = vsub.s32 %v281_v59, %v89_v30  ;;  %p382_p8 = por %p381_p7, %p380_p6 }
  0x19   :  { %p383_p9 = pnand %p382_p8, %p376_p5 }
  0x1a   :  { %54 = vadd.xlane.f32.xlu0 %v53_v11 }
  0x9f   :  { %v50_v14 = vpop.xlane.xlu0 %49 }
  0xa0   :  { %343 = vrsqrt.f32 %v50_v14  ;;  %vm58_vm2 = vcmp.eq.f32.partialorder %v50_v14, inf  ;;  %v61_v18 = vand.u32 2147483648, %v50_v14  ;;  %vm60_vm3 = vcmp.eq.f32.partialorder %v50_v14, 0.0 }
  0xa3   :  { %v55_v15 = vpop.xlane.xlu0 %54 }
  0xa4   :  { %345 = vrsqrt.f32 %v55_v15  ;;  %vm65_vm4 = vcmp.eq.f32.partialorder %v55_v15, inf  ;;  %v68_v24 = vand.u32 2147483648, %v55_v15  ;;  %vm67_vm5 = vcmp.eq.f32.partialorder %v55_v15, 0.0 }
  0xad   :  { %v344_v16 = vpop.eup %343 }
  0xae   :  { %v57_v17 = vmul.f32 %v344_v16, %v50_v14 }
  0xb0   :  { %v59_v19 = vsel %vm58_vm2, %v50_v14, %v57_v17 }
  0xb1   :  { %v346_v20 = vpop.eup %345  ;;  %v62_v21 = vsel %vm60_vm3, %v61_v18, %v59_v19 }
  0xb2   :  { %v64_v22 = vmul.f32 %v346_v20, %v55_v15  ;;  %v70_v23 = vadd.f32 1e-06, %v62_v21 }
  0xb4   :  { %v66_v25 = vsel %vm65_vm4, %v55_v15, %v64_v22  ;;  %347 = vrcp.f32 %v70_v23 }
  0xb5   :  { %v69_v26 = vsel %vm67_vm5, %v68_v24, %v66_v25 }
  0xb6   :  { %v71_v27 = vadd.f32 1e-06, %v69_v26 }
  0xb8   :  { %349 = vrcp.f32 %v71_v27 }
  0xc1   :  { %v348_v31 = vpop.eup %347 }
  0xc2   :  { %v73_v32 = vmul.f32 %v348_v31, %v62_v21 }
  0xc4   :  { %v91_v36 = vrot.slane %v73_v32, %v90_v33 }
  0xc5   :  { %v350_v34 = vpop.eup %349 }
  0xc6   :  { %v75_v35 = vmul.f32 %v350_v34, %v69_v26 }
  0xc8   :  { %v95_v37 = vrot.slane %v75_v35, %v90_v33 }
  0xca   :  { %v97_v38 = vsel %vm96_vm6, %v95_v37, %v91_v36 }
  0xcb   :  { %329 = vmatmul.mubr.msk.f32.vlgmr.msra.gmra.mxu0 %vm98_vm7, %v97_v38 }
 0x18b   :  { %v170_v41 = vpop.f32.mrf.mxu0 }
 0x18c   :  { %v171_v42 = vadd.f32 %v316_v40, %v170_v41 }
 0x18d   :  { %v330_v43 = vpop.f32.mrf.mxu0 }
 0x18e   :  { %v174_v44 = vmax.f32 %v171_v42, 0.0 }
 0x190   :  { %334 = vmatmul.mubr.msk.f32.vlgmr.msra.gmra.mxu1 %vm183_vm8, %v174_v44 }
 0x250   :  { %v253_v46 = vpop.f32.mrf.mxu1 }
 0x251   :  { %v254_v47 = vadd.f32 %v319_v45, %v253_v46 }
 0x252   :  { %v335_v48 = vpop.f32.mrf.mxu1 }
 0x253   :  { %v321_v49 = vmul.f32 -1.442695, %v254_v47 }
 0x255   :  { %351 = vpow2.f32 %v321_v49 }
 0x262   :  { %v352_v50 = vpop.eup %351 }
 0x263   :  { %v260_v51 = vadd.f32 1.0, %v352_v50 }
 0x265   :  { %353 = vrcp.f32 %v260_v51 }
 0x272   :  { %v354_v53 = vpop.eup %353 }
 0x273   :  { %v266_v54 = vrot.slane %v354_v53, %v265_v52  ;;  %v273_v56 = vrot.slane %v354_v53, %v272_v55 }
 0x275   :  { %268 = vbcast.lane.b32.xlu1 %v266_v54, 256 }
 0x279   :  { %275 = vbcast.lane.b32.xlu1 %v273_v56, 256 }
 0x2e7   :  { %v269_v61 = vpop.permute.xlu1 %268 }
 0x2e8   :  { %v285_v62 = vrot.slane %v269_v61, %v284_v60 }
 0x2ea   :  { %v295_v63 = vmul.f32 %v285_v62, %v442_v0 }
 0x2eb   :  { %v276_v2 = vpop.permute.xlu1 %275 }
 0x2ec   :  { %297 = vst [vmem:[#allocation5] sm:$0xff] %v295_v63  ;;  %v292_v3 = vrot.slane %v276_v2, %v284_v60 }
 0x2ee   :  { %v296_v4 = vmul.f32 %v292_v3, %v444_v1 }
 0x2f0   :  { %298 = vst [vmem:[#allocation5 + $0x8] sm:$0xff] %v296_v4 }
 0x2f1   :  { %386 = shalt.err (!%p383_p9)
}
 0x2f2   :  { %310 = dma.vmem_to_hbm [thread:$0]  %s305_s3, 256, %s480_s5, [#allocation4], %s400_s21, %s400_s21, %s401_s22  }
 0x2f3   :  { %397 = dma.done.wait [#allocation4], 256  }
 0x2f4   :  { %398 = vsyncadd [#allocation4], 4294967040 }
 0x2f5   :  { %314 = vsyncpa [#allocation3], 1 }
 0x2f6   :  { %315 = vsyncpa [#allocation4], 1 }

</bundles_post_ra>
